<compile_context>
chip_gen: v7x
topology: tpu7x:2x2x1
jax: 0.10.0
libtpu: 0.0.40
codegen_flags: <defaults>
</compile_context>

<pallas_src>
import functools

import jax
import jax.numpy as jnp
import numpy as np
from jax.experimental import pallas as pl
from jax.experimental.pallas import tpu as pltpu

_STATS_W = 8      # [s_hi, s_lo, s2_hi, s2_lo, 1, 0, 0, 0]
_MAX_TK = 2048    # streamed-A K-tile cap (int8: <= 1 MiB per (512, 2048) tile)


def _round_up(x, m):
    return ((x + m - 1) // m) * m


def _pick_tiles(n, tile_m=None, tile_k=None):
    """Choose (n_pad, tm, tk): tm | n_pad, tk | n_pad, both multiples of 128."""
    n_pad = _round_up(n, 128)
    # K tile: as large as possible (fewer grid steps -> less per-step overhead).
    if tile_k is not None:
        tk = tile_k
    elif n_pad <= _MAX_TK:
        tk = n_pad
    else:
        tk = 128
        for cand in (2048, 1024, 512, 256):
            if n_pad % cand == 0:
                tk = cand
                break
    # Row tile: prefer >= 2 row blocks so the "parallel" axis can feed both
    # TensorCores on v7x; otherwise take the largest that fits.
    if tile_m is not None:
        tm = tile_m
    else:
        tm = min(n_pad, 512)
        for cand in (512, 256, 128):
            if n_pad % cand == 0 and n_pad // cand >= 2:
                tm = cand
                break
    return n_pad, tm, tk


def _node_stats_kernel(h_ref, shift_ref, s_ref):
    """Phase 1: per-node (shifted) feature sums, hi/lo-split into bf16 table."""
    h = h_ref[...].astype(jnp.float32) - shift_ref[...]       # (tm, F) centered
    row_s = jnp.sum(h, axis=1, keepdims=True)                 # (tm, 1)
    row_s2 = jnp.sum(h * h, axis=1, keepdims=True)            # (tm, 1)
    # hi/lo split: x ~= bf16(x) + bf16(x - bf16(x)); keeps ~f32 accuracy while
    # phase 2 runs a pure bf16 MXU matmul (native fast path).
    s_hi = row_s.astype(jnp.bfloat16).astype(jnp.float32)
    s_lo = row_s - s_hi
    s2_hi = row_s2.astype(jnp.bfloat16).astype(jnp.float32)
    s2_lo = row_s2 - s2_hi
    col = jax.lax.broadcasted_iota(jnp.int32, s_ref.shape, 1)
    out = jnp.where(col == 0, s_hi, 0.0)
    out = jnp.where(col == 1, s_lo, out)
    out = jnp.where(col == 2, s2_hi, out)
    out = jnp.where(col == 3, s2_lo, out)
    out = jnp.where(col == 4, 1.0, out)                       # degree counter
    s_ref[...] = out.astype(jnp.bfloat16)


def _aggregate_normalize_kernel(a_ref, stats_ref, h_ref, shift_ref, gamma_ref,
                                beta_ref, o_ref, acc_ref, *, eps, n_feat):
    """Phase 2: stream int8 A tiles, accumulate neighbour stats, normalize."""
    k = pl.program_id(1)

    @pl.when(k == 0)
    def _init():
        acc_ref[...] = jnp.zeros_like(acc_ref)

    # int8 0/1 tile -> bf16 (two-step cast lowers cleanly; pure VPU work hidden
    # under the A-tile DMA), then one bf16 MXU matmul aggregates neighbour
    # feature sums, squared sums and the in-degree (ones column) at once.
    a_bf16 = a_ref[...].astype(jnp.float32).astype(jnp.bfloat16)
    acc_ref[...] += jnp.dot(a_bf16, stats_ref[...],
                            preferred_element_type=jnp.float32)

    @pl.when(k == pl.num_programs(1) - 1)
    def _finalize():
        acc = acc_ref[...]                                     # (tm, 8) f32
        h = h_ref[...].astype(jnp.float32) - shift_ref[...]    # (tm, F) centered
        # Own-node contribution: runs once per row block (finalize only).
        own_s = jnp.sum(h, axis=1, keepdims=True)
        own_s2 = jnp.sum(h * h, axis=1, keepdims=True)
        tot = acc[:, 0:1] + acc[:, 1:2] + own_s                # sum of values
        tot2 = acc[:, 2:3] + acc[:, 3:4] + own_s2              # sum of squares
        cnt = (acc[:, 4:5] + 1.0) * jnp.float32(n_feat)        # (deg + 1) * F
        mean = tot / cnt
        # Unbiased variance (torch.std default). Globally-centered stats keep
        # the subtraction well conditioned even for |mean(h)| >> std(h).
        var = (tot2 - cnt * mean * mean) / (cnt - 1.0)
        var = jnp.maximum(var, 0.0)                            # round-off guard
        # Per-node reciprocal + VPU multiply instead of an (N, F) divide.
        # Padded dst rows give var = 0 -> inv = 1/eps; harmless (sliced off).
        inv = pl.reciprocal(jnp.sqrt(var) + jnp.float32(eps), approx=False)
        # (h - mean_shifted) == (h_orig - mean_orig): shift cancels exactly.
        o_ref[...] = (gamma_ref[...] * ((h - mean) * inv)
                      + beta_ref[...]).astype(o_ref.dtype)


def adja_node_norm(adj, h, gamma, beta, eps=1e-5, *, tile_m=None, tile_k=None):
    """adj: (N, N), adj[dst, src] != 0 iff edge src -> dst; h: (N, F)."""
    n, f = h.shape
    n_pad, tm, tk = _pick_tiles(n, tile_m, tile_k)

    # ---- Adjacency: int8 in HBM, upcast to bf16 inside the kernel. --------
    # Zero-copy fast path when already a small-int/bool array and no padding
    # is required (n % 128 == 0). NOTE: int8/uint8/bool adjacencies are used
    # as-is (assumed binary); other dtypes are thresholded (nonzero == edge).
    if adj.dtype in (np.dtype(np.int8), np.dtype(np.uint8), np.dtype(np.bool_)):
        adj_q = adj.astype(jnp.int8)                 # no-op for int8
    else:
        adj_q = (adj != 0).astype(jnp.int8)
    if n_pad != n:
        adj_q = jnp.pad(adj_q, ((0, n_pad - n), (0, n_pad - n)))

    # ---- h stays in its incoming dtype; pad rows only if needed. ----------
    h_in = h if n_pad == n else jnp.pad(h, ((0, n_pad - n), (0, 0)))
    gamma2d = gamma.reshape(1, f).astype(jnp.float32)
    beta2d = beta.reshape(1, f).astype(jnp.float32)

    # Global mean shift (scalar, one cheap read-only reduce over h): variance
    # is shift invariant, so centering fixes the cancellation-prone
    # (sum_sq - cnt*mean^2) formulation for non-zero-mean features.
    shift = jnp.mean(h, dtype=jnp.float32).reshape(1, 1)

    # ---- Phase 1: per-node stats table (one pass over h). -----------------
    stats = pl.pallas_call(
        _node_stats_kernel,
        out_shape=jax.ShapeDtypeStruct((n_pad, _STATS_W), jnp.bfloat16),
        grid_spec=pltpu.PrefetchScalarGridSpec(
            num_scalar_prefetch=0,
            grid=(n_pad // tm,),
            in_specs=[pl.BlockSpec((tm, f), lambda i: (i, 0)),
                      pl.BlockSpec((1, 1), lambda i: (0, 0))],
            out_specs=pl.BlockSpec((tm, _STATS_W), lambda i: (i, 0)),
        ),
        compiler_params=pltpu.CompilerParams(
            dimension_semantics=("parallel",)),
    )(h_in, shift)

    # ---- Phase 2: stream int8 A tiles, aggregate, normalize. --------------
    kernel = functools.partial(_aggregate_normalize_kernel, eps=eps, n_feat=f)
    out_p = pl.pallas_call(
        kernel,
        out_shape=jax.ShapeDtypeStruct((n_pad, f), h.dtype),
        grid_spec=pltpu.PrefetchScalarGridSpec(
            num_scalar_prefetch=0,
            grid=(n_pad // tm, n_pad // tk),
            in_specs=[
                # The only large streamed operand: int8 A tiles, double-buffered.
                pl.BlockSpec((tm, tk), lambda i, k: (i, k),
                             pipeline_mode=pl.Buffered(2)),
                # src-node stats for this K block (tiny: tk x 8 bf16).
                pl.BlockSpec((tk, _STATS_W), lambda i, k: (k, 0)),
                # dst-row-resident operands (index constant over k).
                pl.BlockSpec((tm, f), lambda i, k: (i, 0)),
                pl.BlockSpec((1, 1), lambda i, k: (0, 0)),
                pl.BlockSpec((1, f), lambda i, k: (0, 0)),
                pl.BlockSpec((1, f), lambda i, k: (0, 0)),
            ],
            out_specs=pl.BlockSpec((tm, f), lambda i, k: (i, 0)),
            scratch_shapes=[pltpu.VMEM((tm, _STATS_W), jnp.float32)],
        ),
        compiler_params=pltpu.CompilerParams(
            dimension_semantics=("parallel", "arbitrary"),
            vmem_limit_bytes=32 * 1024 * 1024),
    )(adj_q, stats, h_in, shift, gamma2d, beta2d)

    return out_p[:n, :]


# --------------------------- references (host) ------------------------------
def _reference_loop(adj, h, gamma, beta, eps=1e-5):
    """Per-node loop reference in float64 (mirrors the DGL reduce_func)."""
    adj = np.asarray(adj, np.float64)
    h = np.asarray(h, np.float64)
    gamma = np.asarray(gamma, np.float64)
    beta = np.asarray(beta, np.float64)
    n, _ = h.shape
    out = np.zeros_like(h)
    for i in range(n):
        srcs = np.nonzero(adj[i] != 0)[0]
        vals = np.concatenate([h[srcs], h[i:i + 1]], axis=0)   # (deg+1, F)
        mean = vals.mean()
        std = vals.std(ddof=1)                                  # unbiased
        out[i] = gamma * (h[i] - mean) / (std + eps) + beta
    return out


def _reference_dense(adj, h, gamma, beta, eps=1e-5):
    """Vectorized float64 reference (for larger graphs)."""
    A = (np.asarray(adj) != 0).astype(np.float64)
    H = np.asarray(h, np.float64)
    gamma = np.asarray(gamma, np.float64)
    beta = np.asarray(beta, np.float64)
    n, f = H.shape
    M = A + np.eye(n)
    cnt = M.sum(1) * f
    rs = H.sum(1)
    rs2 = (H * H).sum(1)
    mean = (M @ rs) / cnt
    sq = (M @ rs2) - 2.0 * mean * (M @ rs) + cnt * mean ** 2
    std = np.sqrt(sq / (cnt - 1.0))
    return gamma[None] * (H - mean[:, None]) / (std[:, None] + eps) + beta[None]


if __name__ == "__main__":
    def _ring_graph(n, extra_prob=0.0, seed=0, dtype=np.float32):
        rng = np.random.RandomState(seed)
        A = np.zeros((n, n), np.float32)
        idx = np.arange(n)
        A[idx, (idx - 1) % n] = 1.0          # every node has in-degree >= 2
        A[idx, (idx + 1) % n] = 1.0
        if extra_prob > 0.0:
            extra = (rng.rand(n, n) < extra_prob).astype(np.float32)
            np.fill_diagonal(extra, 0.0)
            A = np.maximum(A, extra)
        return A.astype(dtype)

    key = jax.random.PRNGKey(0)

    # ---- Test 1: tiny graph, float32 adjacency (threshold + padding path). -
    n1, f1 = 8, 32
    key, k1, k2, k3 = jax.random.split(key, 4)
    h1 = jax.random.normal(k1, (n1, f1), dtype=jnp.float32)
    gamma1 = 1.0 + 0.1 * jax.random.normal(k2, (f1,), dtype=jnp.float32)
    beta1 = 0.05 * jax.random.normal(k3, (f1,), dtype=jnp.float32)
    adj1 = jnp.asarray(_ring_graph(n1))
    out1 = jax.block_until_ready(adja_node_norm(adj1, h1, gamma1, beta1))
    ref1 = _reference_loop(adj1, h1, gamma1, beta1)
    assert np.allclose(np.asarray(out1), ref1, atol=3e-4, rtol=3e-4), \
        "test 1 mismatch vs reference"

    # ---- Test 2: n % 128 == 0 -> zero-copy int8 adjacency path; tile
    # overrides force a (2, 2) grid (multi-row-block + K accumulation); h has
    # a large common offset to exercise the shifted-variance conditioning. ---
    n2, f2 = 256, 32
    key, k1, k2, k3 = jax.random.split(key, 4)
    h2 = 4.0 + jax.random.normal(k1, (n2, f2), dtype=jnp.float32)
    gamma2 = 1.0 + 0.1 * jax.random.normal(k2, (f2,), dtype=jnp.float32)
    beta2 = 0.05 * jax.random.normal(k3, (f2,), dtype=jnp.float32)
    adj2 = jnp.asarray(_ring_graph(n2, extra_prob=0.02, seed=1, dtype=np.int8))
    out2 = jax.block_until_ready(
        adja_node_norm(adj2, h2, gamma2, beta2, tile_m=128, tile_k=128))
    ref2 = _reference_dense(adj2, h2, gamma2, beta2)
    assert np.allclose(np.asarray(out2), ref2, atol=3e-4, rtol=3e-4), \
        "test 2 mismatch vs reference"

    # ---- Test 3: ragged N (padding path) with default tile selection. ------
    n3, f3 = 520, 32
    key, k1, k2, k3 = jax.random.split(key, 4)
    h3 = jax.random.normal(k1, (n3, f3), dtype=jnp.float32)
    gamma3 = 1.0 + 0.1 * jax.random.normal(k2, (f3,), dtype=jnp.float32)
    beta3 = 0.05 * jax.random.normal(k3, (f3,), dtype=jnp.float32)
    adj3 = jnp.asarray(_ring_graph(n3, extra_prob=0.01, seed=2))
    out3 = jax.block_until_ready(adja_node_norm(adj3, h3, gamma3, beta3))
    ref3 = _reference_dense(adj3, h3, gamma3, beta3)
    assert np.allclose(np.asarray(out3), ref3, atol=3e-4, rtol=3e-4), \
        "test 3 mismatch vs reference"

    print("KERNEL_OK")
</pallas_src>

<mosaic_0001>
module attributes {stable_mosaic.version = 11 : i64} {
  func.func @_node_stats_kernel(%arg0: i32, %arg1: memref<128x32xf32, #tpu.memory_space<vmem>>, %arg2: memref<1x1xf32, #tpu.memory_space<vmem>>, %arg3: memref<128x8xbf16, #tpu.memory_space<vmem>>) attributes {dimension_semantics = [#tpu.dimension_semantics<parallel>], iteration_bounds = array<i64: 1>, scalar_prefetch = 0 : i64, scratch_operands = 0 : i64, tpu.core_type = #tpu.core_type<tc>, window_params = [{transform_indices = @transform_0, window_bounds = array<i64: 128, 32>}, {pipeline_mode = #tpu.pipeline_mode<synchronous>, transform_indices = @transform_1, window_bounds = array<i64: 1, 1>}, {transform_indices = @transform_2, window_bounds = array<i64: 128, 8>}]} {
    %c0 = arith.constant 0 : index
    %c0_0 = arith.constant 0 : index
    %0 = vector.load %arg1[%c0, %c0_0] : memref<128x32xf32, #tpu.memory_space<vmem>>, vector<128x32xf32>
    %c0_1 = arith.constant 0 : index
    %c0_2 = arith.constant 0 : index
    %1 = vector.load %arg2[%c0_1, %c0_2] : memref<1x1xf32, #tpu.memory_space<vmem>>, vector<1x1xf32>
    %2 = vector.broadcast %1 : vector<1x1xf32> to vector<128x32xf32>
    %3 = arith.subf %0, %2 : vector<128x32xf32>
    %cst = arith.constant dense<0.000000e+00> : vector<128xf32>
    %4 = vector.multi_reduction <add>, %3, %cst [1] : vector<128x32xf32> to vector<128xf32>
    %5 = vector.shape_cast %4 : vector<128xf32> to vector<128x1xf32>
    %6 = arith.mulf %3, %3 : vector<128x32xf32>
    %cst_3 = arith.constant dense<0.000000e+00> : vector<128xf32>
    %7 = vector.multi_reduction <add>, %6, %cst_3 [1] : vector<128x32xf32> to vector<128xf32>
    %8 = vector.shape_cast %7 : vector<128xf32> to vector<128x1xf32>
    %9 = arith.truncf %5 : vector<128x1xf32> to vector<128x1xbf16>
    %10 = arith.extf %9 : vector<128x1xbf16> to vector<128x1xf32>
    %11 = arith.subf %5, %10 : vector<128x1xf32>
    %12 = arith.truncf %8 : vector<128x1xf32> to vector<128x1xbf16>
    %13 = arith.extf %12 : vector<128x1xbf16> to vector<128x1xf32>
    %14 = arith.subf %8, %13 : vector<128x1xf32>
    %15 = tpu.iota {dimensions = array<i32: 1>} : vector<128x8xi32>
    %c0_i32 = arith.constant 0 : i32
    %16 = vector.broadcast %c0_i32 : i32 to vector<128x8xi32>
    %17 = arith.cmpi eq, %15, %16 : vector<128x8xi32>
    %cst_4 = arith.constant 0.000000e+00 : f32
    %18 = vector.shape_cast %10 : vector<128x1xf32> to vector<128x1xf32>
    %19 = vector.broadcast %18 : vector<128x1xf32> to vector<128x8xf32>
    %20 = vector.broadcast %cst_4 : f32 to vector<128x8xf32>
    %21 = arith.select %17, %19, %20 : vector<128x8xi1>, vector<128x8xf32>
    %c1_i32 = arith.constant 1 : i32
    %22 = vector.broadcast %c1_i32 : i32 to vector<128x8xi32>
    %23 = arith.cmpi eq, %15, %22 : vector<128x8xi32>
    %24 = vector.shape_cast %11 : vector<128x1xf32> to vector<128x1xf32>
    %25 = vector.broadcast %24 : vector<128x1xf32> to vector<128x8xf32>
    %26 = arith.select %23, %25, %21 : vector<128x8xi1>, vector<128x8xf32>
    %c2_i32 = arith.constant 2 : i32
    %27 = vector.broadcast %c2_i32 : i32 to vector<128x8xi32>
    %28 = arith.cmpi eq, %15, %27 : vector<128x8xi32>
    %29 = vector.shape_cast %13 : vector<128x1xf32> to vector<128x1xf32>
    %30 = vector.broadcast %29 : vector<128x1xf32> to vector<128x8xf32>
    %31 = arith.select %28, %30, %26 : vector<128x8xi1>, vector<128x8xf32>
    %c3_i32 = arith.constant 3 : i32
    %32 = vector.broadcast %c3_i32 : i32 to vector<128x8xi32>
    %33 = arith.cmpi eq, %15, %32 : vector<128x8xi32>
    %34 = vector.shape_cast %14 : vector<128x1xf32> to vector<128x1xf32>
    %35 = vector.broadcast %34 : vector<128x1xf32> to vector<128x8xf32>
    %36 = arith.select %33, %35, %31 : vector<128x8xi1>, vector<128x8xf32>
    %c4_i32 = arith.constant 4 : i32
    %37 = vector.broadcast %c4_i32 : i32 to vector<128x8xi32>
    %38 = arith.cmpi eq, %15, %37 : vector<128x8xi32>
    %cst_5 = arith.constant 1.000000e+00 : f32
    %39 = vector.broadcast %cst_5 : f32 to vector<128x8xf32>
    %40 = arith.select %38, %39, %36 : vector<128x8xi1>, vector<128x8xf32>
    %41 = arith.truncf %40 : vector<128x8xf32> to vector<128x8xbf16>
    %c0_6 = arith.constant 0 : index
    %c0_7 = arith.constant 0 : index
    %42 = vector.load %arg3[%c0_6, %c0_7] : memref<128x8xbf16, #tpu.memory_space<vmem>>, vector<128x8xbf16>
    tpu.vector_store %arg3[%c0_6, %c0_7], %41 {strides = array<i32>} : memref<128x8xbf16, #tpu.memory_space<vmem>>, vector<128x8xbf16>,
    return
  }
  func.func @transform_0(%arg0: i32) -> (i32, i32) {
    %c0_i32 = arith.constant 0 : i32
    %c0_i32_0 = arith.constant 0 : i32
    return %arg0, %c0_i32 : i32, i32
  }
  func.func @transform_1(%arg0: i32) -> (i32, i32) {
    %c0_i32 = arith.constant 0 : i32
    %c0_i32_0 = arith.constant 0 : i32
    %c0_i32_1 = arith.constant 0 : i32
    return %c0_i32, %c0_i32_0 : i32, i32
  }
  func.func @transform_2(%arg0: i32) -> (i32, i32) {
    %c0_i32 = arith.constant 0 : i32
    %c0_i32_0 = arith.constant 0 : i32
    return %arg0, %c0_i32 : i32, i32
  }
}

</mosaic_0001>

<bundles_post_ra>
// kernel: tpu_custom_call.1
= control target key start
LH: loop header
LB: loop body
LE: loop exit
PB: predicated region body
PF: predicated region fallthrough
CT: control target
= control target key end

     0   :  { %v455_v0 = vmov 0   ;;  %vm55_vm0 = vcmask 261120   ;;  %vm399_vm6 = vcmask 60416   ;;  %s864_s1 = inlined_call_operand.<no memory space> [shape: f32[1,1], index: 1, kind: input, shape index: {}]   ;;  %s865_s0 = inlined_call_operand.vmem [shape: f32[128,32], index: 0, kind: input, shape index: {}]   ;;  %s866_s2 = inlined_call_operand.vmem [shape: bf16[128,8], index: 2, kind: output, shape index: {}]  }
   0x1   :  { %454 = vset.pattern.permute.xlu0 %v455_v0  ;;  %v7_v1 = vstv %s864_s1  ;;  %v14_v3 = vld [vmem:[%s865_s0 + $0x8] sm:$0xff]  ;;  %v13_v4 = vld [vmem:[%s865_s0] sm:$0xff]  ;;  %v15_v6 = vld [vmem:[%s865_s0 + $0x10] sm:$0xff] }
   0x2   :  { %8 = vst [vmem:[#allocation2] sm:$0x1] %v7_v1  ;;  %v23_v7 = vld [vmem:[%s865_s0 + $0x50] sm:$0xff]  ;;  %v16_v14 = vld [vmem:[%s865_s0 + $0x18] sm:$0xff]  ;;  %v25_v15 = vld [vmem:[%s865_s0 + $0x60] sm:$0xff] }
   0x3   :  { %v17_v20 = vld [vmem:[%s865_s0 + $0x20] sm:$0xff]  ;;  %v27_v21 = vld [vmem:[%s865_s0 + $0x70] sm:$0xff]  ;;  %v18_v26 = vld [vmem:[%s865_s0 + $0x28] sm:$0xff] }
   0x4   :  { %v19_v31 = vld [vmem:[%s865_s0 + $0x30] sm:$0xff]  ;;  %v20_v36 = vld [vmem:[%s865_s0 + $0x38] sm:$0xff]  ;;  %v21_v41 = vld [vmem:[%s865_s0 + $0x40] sm:$0xff] }
   0x5   :  { %v22_v46 = vld [vmem:[%s865_s0 + $0x48] sm:$0xff]  ;;  %v24_v51 = vld [vmem:[%s865_s0 + $0x58] sm:$0xff] }
   0x6   :  { %v26_v56 = vld [vmem:[%s865_s0 + $0x68] sm:$0xff]  ;;  %v28_v61 = vld [vmem:[%s865_s0 + $0x78] sm:$0xff] }
   0x9   :  { %v420_v2 = vld [vmem:[#allocation2] ss:$0 sm:$0xff] }
   0xa   :  { %36 = vperm.xlu0 %454, %v420_v2  }
  0x89   :  { %v480_v5 = vpop.permute.xlu0 %36 }
  0x8a   :  { %v489_v8 = vsub.f32 %v14_v3, %v480_v5  ;;  %v39_v9 = vsub.f32 %v13_v4, %v480_v5  ;;  %v41_v12 = vsub.f32 %v15_v6, %v480_v5  ;;  %v49_v13 = vsub.f32 %v23_v7, %v480_v5 }
  0x8b   :  { %v506_v18 = vsub.f32 %v16_v14, %v480_v5  ;;  %v51_v19 = vsub.f32 %v25_v15, %v480_v5  ;;  %v43_v24 = vsub.f32 %v17_v20, %v480_v5  ;;  %v53_v25 = vsub.f32 %v27_v21, %v480_v5 }
  0x8c   :  { %v59_v10 = vsel %vm55_vm0, %v489_v8, 0.0  ;;  %v56_v11 = vsel %vm55_vm0, %v39_v9, 0.0  ;;  %v62_v16 = vsel %vm55_vm0, %v41_v12, 0.0  ;;  %v86_v17 = vsel %vm55_vm0, %v49_v13, 0.0 }
  0x8d   :  { %60 = vadd.xlane.f32.xlu1 %v59_v10  ;;  %57 = vadd.xlane.f32.xlu0 %v56_v11  ;;  %v65_v22 = vsel %vm55_vm0, %v506_v18, 0.0  ;;  %v92_v23 = vsel %vm55_vm0, %v51_v19, 0.0  ;;  %v68_v27 = vsel %vm55_vm0, %v43_v24, 0.0  ;;  %v98_v28 = vsel %vm55_vm0, %v53_v25, 0.0 }
  0x8e   :  { %v44_v29 = vsub.f32 %v18_v26, %v480_v5  ;;  %v104_v30 = vmul.f32 %v39_v9, %v39_v9  ;;  %v45_v34 = vsub.f32 %v19_v31, %v480_v5  ;;  %v106_v35 = vmul.f32 %v41_v12, %v41_v12 }
  0x8f   :  { %v46_v39 = vsub.f32 %v20_v36, %v480_v5  ;;  %v108_v40 = vmul.f32 %v43_v24, %v43_v24  ;;  %v47_v44 = vsub.f32 %v21_v41, %v480_v5  ;;  %v48_v49 = vsub.f32 %v22_v46, %v480_v5 }
  0x90   :  { %v71_v32 = vsel %vm55_vm0, %v44_v29, 0.0  ;;  %v120_v33 = vsel %vm55_vm0, %v104_v30, 0.0  ;;  %v74_v37 = vsel %vm55_vm0, %v45_v34, 0.0  ;;  %v126_v38 = vsel %vm55_vm0, %v106_v35, 0.0 }
  0x91   :  { %63 = vadd.xlane.f32.xlu1 %v62_v16  ;;  %87 = vadd.xlane.f32.xlu0 %v86_v17  ;;  %v77_v42 = vsel %vm55_vm0, %v46_v39, 0.0  ;;  %v132_v43 = vsel %vm55_vm0, %v108_v40, 0.0  ;;  %v110_v45 = vmul.f32 %v45_v34, %v45_v34  ;;  %v80_v47 = vsel %vm55_vm0, %v47_v44, 0.0 }
  0x92   :  { %v112_v50 = vmul.f32 %v47_v44, %v47_v44  ;;  %v83_v52 = vsel %vm55_vm0, %v48_v49, 0.0  ;;  %v50_v54 = vsub.f32 %v24_v51, %v480_v5  ;;  %v114_v55 = vmul.f32 %v49_v13, %v49_v13 }
  0x93   :  { %v138_v48 = vsel %vm55_vm0, %v110_v45, 0.0  ;;  %v52_v59 = vsub.f32 %v26_v56, %v480_v5  ;;  %v116_v60 = vmul.f32 %v51_v19, %v51_v19  ;;  %v54_v0 = vsub.f32 %v28_v61, %v480_v5 }
  0x94   :  { %v144_v53 = vsel %vm55_vm0, %v112_v50, 0.0  ;;  %v89_v57 = vsel %vm55_vm0, %v50_v54, 0.0  ;;  %v150_v58 = vsel %vm55_vm0, %v114_v55, 0.0  ;;  %v118_v1 = vmul.f32 %v53_v25, %v53_v25 }
  0x95   :  { %66 = vadd.xlane.f32.xlu1 %v65_v22  ;;  %93 = vadd.xlane.f32.xlu0 %v92_v23  ;;  %v95_v62 = vsel %vm55_vm0, %v52_v59, 0.0  ;;  %v156_v63 = vsel %vm55_vm0, %v116_v60, 0.0  ;;  %v101_v2 = vsel %vm55_vm0, %v54_v0, 0.0  ;;  %v105_v4 = vmul.f32 %v489_v8, %v489_v8 }
  0x96   :  { %v162_v3 = vsel %vm55_vm0, %v118_v1, 0.0  ;;  %v107_v7 = vmul.f32 %v506_v18, %v506_v18  ;;  %v109_v9 = vmul.f32 %v44_v29, %v44_v29  ;;  %v111_v11 = vmul.f32 %v46_v39, %v46_v39 }
  0x97   :  { %v123_v6 = vsel %vm55_vm0, %v105_v4, 0.0  ;;  %v113_v13 = vmul.f32 %v48_v49, %v48_v49  ;;  %v115_v14 = vmul.f32 %v50_v54, %v50_v54  ;;  %v117_v16 = vmul.f32 %v52_v59, %v52_v59 }
  0x98   :  { %v129_v5 = vsel %vm55_vm0, %v107_v7, 0.0  ;;  %v135_v10 = vsel %vm55_vm0, %v109_v9, 0.0  ;;  %v141_v12 = vsel %vm55_vm0, %v111_v11, 0.0  ;;  %v119_v18 = vmul.f32 %v54_v0, %v54_v0 }
  0x99   :  { %69 = vadd.xlane.f32.xlu1 %v68_v27  ;;  %99 = vadd.xlane.f32.xlu0 %v98_v28  ;;  %v147_v8 = vsel %vm55_vm0, %v113_v13, 0.0  ;;  %v153_v15 = vsel %vm55_vm0, %v115_v14, 0.0  ;;  %v159_v17 = vsel %vm55_vm0, %v117_v16, 0.0 }
  0x9a   :  { %v165_v19 = vsel %vm55_vm0, %v119_v18, 0.0 }
  0x9d   :  { %72 = vadd.xlane.f32.xlu1 %v71_v32  ;;  %121 = vadd.xlane.f32.xlu0 %v120_v33  ;;  %v248_v32 = vlaneseq }
  0x9f   :  { %v588_v35 = vand.u32 127, %v248_v32 }
  0xa1   :  { %75 = vadd.xlane.f32.xlu1 %v74_v37  ;;  %127 = vadd.xlane.f32.xlu0 %v126_v38  ;;  %vm250_vm1 = vcmp.eq.s32.totalorder %v588_v35, 0  ;;  %vm267_vm2 = vcmp.eq.s32.totalorder %v588_v35, 1  ;;  %vm284_vm3 = vcmp.eq.s32.totalorder %v588_v35, 2  ;;  %vm301_vm4 = vcmp.eq.s32.totalorder %v588_v35, 3 }
  0xa2   :  { %vm318_vm5 = vcmp.eq.s32.totalorder %v588_v35, 4 }
  0xa5   :  { %78 = vadd.xlane.f32.xlu1 %v77_v42  ;;  %133 = vadd.xlane.f32.xlu0 %v132_v43 }
  0xa9   :  { %81 = vadd.xlane.f32.xlu1 %v80_v47  ;;  %139 = vadd.xlane.f32.xlu0 %v138_v48 }
  0xad   :  { %84 = vadd.xlane.f32.xlu1 %v83_v52  ;;  %145 = vadd.xlane.f32.xlu0 %v144_v53 }
  0xb1   :  { %90 = vadd.xlane.f32.xlu1 %v89_v57  ;;  %151 = vadd.xlane.f32.xlu0 %v150_v58 }
  0xb5   :  { %96 = vadd.xlane.f32.xlu1 %v95_v62  ;;  %157 = vadd.xlane.f32.xlu0 %v156_v63 }
  0xb9   :  { %102 = vadd.xlane.f32.xlu1 %v101_v2  ;;  %163 = vadd.xlane.f32.xlu0 %v162_v3 }
  0xbd   :  { %124 = vadd.xlane.f32.xlu1 %v123_v6 }
  0xc1   :  { %130 = vadd.xlane.f32.xlu1 %v129_v5 }
  0xc5   :  { %136 = vadd.xlane.f32.xlu1 %v135_v10 }
  0xc9   :  { %142 = vadd.xlane.f32.xlu1 %v141_v12 }
  0xcd   :  { %148 = vadd.xlane.f32.xlu1 %v147_v8 }
  0xd1   :  { %154 = vadd.xlane.f32.xlu1 %v153_v15 }
  0xd5   :  { %160 = vadd.xlane.f32.xlu1 %v159_v17 }
  0xd9   :  { %166 = vadd.xlane.f32.xlu1 %v165_v19 }
 0x11a   :  { %v61_v20 = vpop.xlane.xlu1 %60  ;;  %v58_v23 = vpop.xlane.xlu0 %57 }
 0x11b   :  { %v168_v34 = vpack.c.bf16 %v61_v20, %v58_v23 }
 0x11d   :  { %v176_v40 = vunpack.c.l.bf16 %v168_v34  ;;  %v177_v41 = vunpack.c.h.bf16 %v168_v34 }
 0x11e   :  { %v64_v21 = vpop.xlane.xlu1 %63  ;;  %v582_v26 = vpop.xlane.xlu0 %87 }
 0x11f   :  { %v192_v47 = vsub.f32 %v58_v23, %v176_v40  ;;  %v193_v48 = vsub.f32 %v61_v20, %v177_v41  ;;  %v251_v49 = vsel %vm250_vm1, %v176_v40, 0.0  ;;  %v252_v52 = vsel %vm250_vm1, %v177_v41, 0.0 }
 0x121   :  { %v268_v2 = vsel %vm267_vm2, %v192_v47, %v251_v49  ;;  %v269_v3 = vsel %vm267_vm2, %v193_v48, %v252_v52 }
 0x122   :  { %v67_v22 = vpop.xlane.xlu1 %66  ;;  %v584_v28 = vpop.xlane.xlu0 %93 }
 0x123   :  { %v169_v36 = vpack.c.bf16 %v67_v22, %v64_v21 }
 0x125   :  { %v178_v42 = vunpack.c.l.bf16 %v169_v36  ;;  %v179_v43 = vunpack.c.h.bf16 %v169_v36 }
 0x126   :  { %v70_v24 = vpop.xlane.xlu1 %69  ;;  %v586_v31 = vpop.xlane.xlu0 %99 }
 0x127   :  { %v194_v53 = vsub.f32 %v64_v21, %v178_v42  ;;  %v195_v54 = vsub.f32 %v67_v22, %v179_v43  ;;  %v253_v55 = vsel %vm250_vm1, %v178_v42, 0.0  ;;  %v254_v56 = vsel %vm250_vm1, %v179_v43, 0.0 }
 0x129   :  { %v270_v4 = vsel %vm267_vm2, %v194_v53, %v253_v55  ;;  %v271_v6 = vsel %vm267_vm2, %v195_v54, %v254_v56 }
 0x12a   :  { %v73_v25 = vpop.xlane.xlu1 %72  ;;  %v122_v37 = vpop.xlane.xlu0 %121 }
 0x12b   :  { %v170_v39 = vpack.c.bf16 %v73_v25, %v70_v24 }
 0x12d   :  { %v180_v46 = vunpack.c.l.bf16 %v170_v39  ;;  %v181_v57 = vunpack.c.h.bf16 %v170_v39 }
 0x12e   :  { %v76_v27 = vpop.xlane.xlu1 %75  ;;  %v598_v50 = vpop.xlane.xlu0 %127 }
 0x12f   :  { %v196_v61 = vsub.f32 %v70_v24, %v180_v46  ;;  %v255_v62 = vsel %vm250_vm1, %v180_v46, 0.0  ;;  %v197_v7 = vsub.f32 %v73_v25, %v181_v57  ;;  %v256_v5 = vsel %vm250_vm1, %v181_v57, 0.0 }
 0x131   :  { %v627_v13 = vsel %vm267_vm2, %v196_v61, %v255_v62  ;;  %v273_v24 = vsel %vm267_vm2, %v197_v7, %v256_v5 }
 0x132   :  { %v79_v29 = vpop.xlane.xlu1 %78  ;;  %v134_v11 = vpop.xlane.xlu0 %133 }
 0x133   :  { %v171_v44 = vpack.c.bf16 %v79_v29, %v76_v27 }
 0x135   :  { %v182_v58 = vunpack.c.l.bf16 %v171_v44  ;;  %v183_v59 = vunpack.c.h.bf16 %v171_v44 }
 0x136   :  { %v82_v30 = vpop.xlane.xlu1 %81  ;;  %v653_v39 = vpop.xlane.xlu0 %139 }
 0x137   :  { %v198_v9 = vsub.f32 %v76_v27, %v182_v58  ;;  %v199_v10 = vsub.f32 %v79_v29, %v183_v59  ;;  %v257_v8 = vsel %vm250_vm1, %v182_v58, 0.0  ;;  %v258_v14 = vsel %vm250_vm1, %v183_v59, 0.0 }
 0x139   :  { %v643_v25 = vsel %vm267_vm2, %v198_v9, %v257_v8  ;;  %v647_v27 = vsel %vm267_vm2, %v199_v10, %v258_v14 }
 0x13a   :  { %v85_v33 = vpop.xlane.xlu1 %84 }
 0x13b   :  { %v172_v51 = vpack.c.bf16 %v85_v33, %v82_v30 }
 0x13d   :  { %v184_v63 = vunpack.c.l.bf16 %v172_v51  ;;  %v185_v0 = vunpack.c.h.bf16 %v172_v51 }
 0x13e   :  { %v590_v38 = vpop.xlane.xlu1 %90 }
 0x13f   :  { %v173_v1 = vpack.c.bf16 %v590_v38, %v582_v26  ;;  %v200_v16 = vsub.f32 %v82_v30, %v184_v63  ;;  %v201_v17 = vsub.f32 %v85_v33, %v185_v0  ;;  %v259_v18 = vsel %vm250_vm1, %v184_v63, 0.0 }
 0x140   :  { %v260_v20 = vsel %vm250_vm1, %v185_v0, 0.0  ;;  %v146_v0 = vpop.xlane.xlu0 %145 }
 0x141   :  { %v186_v19 = vunpack.c.l.bf16 %v173_v1  ;;  %v187_v29 = vunpack.c.h.bf16 %v173_v1  ;;  %v657_v40 = vsel %vm267_vm2, %v200_v16, %v259_v18  ;;  %v661_v41 = vsel %vm267_vm2, %v201_v17, %v260_v20 }
 0x142   :  { %v593_v45 = vpop.xlane.xlu1 %96 }
 0x143   :  { %v174_v21 = vpack.c.bf16 %v593_v45, %v584_v28  ;;  %v202_v42 = vsub.f32 %v582_v26, %v186_v19  ;;  %v203_v26 = vsub.f32 %v590_v38, %v187_v29  ;;  %v261_v62 = vsel %vm250_vm1, %v186_v19, 0.0 }
 0x144   :  { %v262_v63 = vsel %vm250_vm1, %v187_v29, 0.0 }
 0x145   :  { %v188_v43 = vunpack.c.l.bf16 %v174_v21  ;;  %v189_v44 = vunpack.c.h.bf16 %v174_v21  ;;  %v278_v29 = vsel %vm267_vm2, %v202_v42, %v261_v62 }
 0x146   :  { %v606_v60 = vpop.xlane.xlu1 %102 }
 0x147   :  { %v204_v1 = vsub.f32 %v584_v28, %v188_v43  ;;  %v263_v14 = vsel %vm250_vm1, %v188_v43, 0.0  ;;  %v264_v17 = vsel %vm250_vm1, %v189_v44, 0.0 }
 0x14a   :  { %v125_v12 = vpop.xlane.xlu1 %124 }
 0x14b   :  { %v208_v15 = vpack.c.bf16 %v125_v12, %v122_v37 }
 0x14d   :  { %v216_v22 = vunpack.c.l.bf16 %v208_v15  ;;  %v217_v23 = vunpack.c.h.bf16 %v208_v15 }
 0x14e   :  { %v131_v30 = vpop.xlane.xlu1 %130 }
 0x14f   :  { %v232_v32 = vsub.f32 %v122_v37, %v216_v22  ;;  %v233_v33 = vsub.f32 %v125_v12, %v217_v23  ;;  %v285_v34 = vsel %vm284_vm3, %v216_v22, %v268_v2  ;;  %v286_v36 = vsel %vm284_vm3, %v217_v23, %v269_v3 }
 0x150   :  { %v209_v37 = vpack.c.bf16 %v131_v30, %v598_v50  ;;  %v205_v2 = vsub.f32 %v593_v45, %v189_v44 }
 0x151   :  { %v302_v46 = vsel %vm301_vm4, %v232_v32, %v285_v34  ;;  %v303_v47 = vsel %vm301_vm4, %v233_v33, %v286_v36  ;;  %v152_v32 = vpop.xlane.xlu0 %151  ;;  %v280_v33 = vsel %vm267_vm2, %v204_v1, %v263_v14 }
 0x152   :  { %v319_v48 = vsel %vm318_vm5, 1.0, %v302_v46  ;;  %v320_v49 = vsel %vm318_vm5, 1.0, %v303_v47  ;;  %v218_v51 = vunpack.c.l.bf16 %v209_v37  ;;  %v219_v52 = vunpack.c.h.bf16 %v209_v37  ;;  %v137_v53 = vpop.xlane.xlu1 %136 }
 0x153   :  { %v437_v54 = vpack.c.bf16 %v319_v48, %v319_v48  ;;  %v438_v55 = vpack.c.bf16 %v320_v49, %v320_v49  ;;  %v210_v56 = vpack.c.bf16 %v137_v53, %v134_v11  ;;  %v281_v44 = vsel %vm267_vm2, %v205_v2, %v264_v17 }
 0x154   :  { %v234_v57 = vsub.f32 %v598_v50, %v218_v51  ;;  %v235_v58 = vsub.f32 %v131_v30, %v219_v52  ;;  %v287_v59 = vsel %vm284_vm3, %v218_v51, %v270_v4  ;;  %v288_v61 = vsel %vm284_vm3, %v219_v52, %v271_v6 }
 0x155   :  { %400 = vst.msk [vmem:[%s866_s2] sm:$0xf] %vm399_vm6, %v437_v54  ;;  %401 = vst.msk [vmem:[%s866_s2 + $0x4] sm:$0xf] %vm399_vm6, %v438_v55  ;;  %v220_v38 = vunpack.c.l.bf16 %v210_v56  ;;  %v221_v50 = vunpack.c.h.bf16 %v210_v56  ;;  %v279_v30 = vsel %vm267_vm2, %v203_v26, %v262_v63 }
 0x156   :  { %v304_v3 = vsel %vm301_vm4, %v234_v57, %v287_v59  ;;  %v305_v4 = vsel %vm301_vm4, %v235_v58, %v288_v61  ;;  %v143_v6 = vpop.xlane.xlu1 %142  ;;  %v158_v59 = vpop.xlane.xlu0 %157 }
 0x157   :  { %v321_v7 = vsel %vm318_vm5, 1.0, %v304_v3  ;;  %v322_v5 = vsel %vm318_vm5, 1.0, %v305_v4  ;;  %v236_v9 = vsub.f32 %v134_v11, %v220_v38  ;;  %v237_v10 = vsub.f32 %v137_v53, %v221_v50 }
 0x158   :  { %v439_v12 = vpack.c.bf16 %v321_v7, %v321_v7  ;;  %v440_v8 = vpack.c.bf16 %v322_v5, %v322_v5  ;;  %v289_v28 = vsel %vm284_vm3, %v220_v38, %v627_v13  ;;  %v290_v45 = vsel %vm284_vm3, %v221_v50, %v273_v24 }
 0x159   :  { %v306_v15 = vsel %vm301_vm4, %v236_v9, %v289_v28  ;;  %v307_v16 = vsel %vm301_vm4, %v237_v10, %v290_v45  ;;  %v211_v11 = vpack.c.bf16 %v143_v6, %v653_v39  ;;  %v717_v13 = vpack.c.bf16 %v606_v60, %v586_v31 }
 0x15a   :  { %402 = vst.msk [vmem:[%s866_s2 + $0x8] sm:$0xf] %vm399_vm6, %v439_v12  ;;  %403 = vst.msk [vmem:[%s866_s2 + $0xc] sm:$0xf] %vm399_vm6, %v440_v8  ;;  %v323_v18 = vsel %vm318_vm5, 1.0, %v306_v15  ;;  %v324_v19 = vsel %vm318_vm5, 1.0, %v307_v16  ;;  %v149_v20 = vpop.xlane.xlu1 %148 }
 0x15b   :  { %v441_v21 = vpack.c.bf16 %v323_v18, %v323_v18  ;;  %v442_v22 = vpack.c.bf16 %v324_v19, %v324_v19  ;;  %v222_v23 = vunpack.c.l.bf16 %v211_v11  ;;  %v223_v24 = vunpack.c.h.bf16 %v211_v11  ;;  %v164_v11 = vpop.xlane.xlu0 %163 }
 0x15c   :  { %v212_v34 = vpack.c.bf16 %v149_v20, %v146_v0  ;;  %v190_v46 = vunpack.c.l.bf16 %v717_v13  ;;  %v191_v51 = vunpack.c.h.bf16 %v717_v13 }
 0x15d   :  { %404 = vst.msk [vmem:[%s866_s2 + $0x10] sm:$0xf] %vm399_vm6, %v441_v21  ;;  %405 = vst.msk [vmem:[%s866_s2 + $0x14] sm:$0xf] %vm399_vm6, %v442_v22  ;;  %v238_v36 = vsub.f32 %v653_v39, %v222_v23  ;;  %v239_v42 = vsub.f32 %v143_v6, %v223_v24  ;;  %v291_v37 = vsel %vm284_vm3, %v222_v23, %v643_v25 }
 0x15e   :  { %v292_v43 = vsel %vm284_vm3, %v223_v24, %v647_v27  ;;  %v224_v47 = vunpack.c.l.bf16 %v212_v34  ;;  %v225_v48 = vunpack.c.h.bf16 %v212_v34  ;;  %v155_v49 = vpop.xlane.xlu1 %154  ;;  %v207_v10 = vsub.f32 %v606_v60, %v191_v51 }
 0x15f   :  { %v308_v39 = vsel %vm301_vm4, %v238_v36, %v291_v37  ;;  %v309_v25 = vsel %vm301_vm4, %v239_v42, %v292_v43  ;;  %v213_v52 = vpack.c.bf16 %v155_v49, %v152_v32  ;;  %v265_v12 = vsel %vm250_vm1, %v190_v46, 0.0 }
 0x160   :  { %v325_v27 = vsel %vm318_vm5, 1.0, %v308_v39  ;;  %v326_v53 = vsel %vm318_vm5, 1.0, %v309_v25  ;;  %v240_v26 = vsub.f32 %v146_v0, %v224_v47  ;;  %v241_v54 = vsub.f32 %v149_v20, %v225_v48 }
 0x161   :  { %v443_v55 = vpack.c.bf16 %v325_v27, %v325_v27  ;;  %v444_v56 = vpack.c.bf16 %v326_v53, %v326_v53  ;;  %v293_v57 = vsel %vm284_vm3, %v224_v47, %v657_v40  ;;  %v294_v58 = vsel %vm284_vm3, %v225_v48, %v661_v41 }
 0x162   :  { %v310_v61 = vsel %vm301_vm4, %v240_v26, %v293_v57  ;;  %v311_v62 = vsel %vm301_vm4, %v241_v54, %v294_v58  ;;  %v226_v63 = vunpack.c.l.bf16 %v213_v52  ;;  %v227_v38 = vunpack.c.h.bf16 %v213_v52  ;;  %v161_v50 = vpop.xlane.xlu1 %160 }
 0x163   :  { %v206_v0 = vsub.f32 %v586_v31, %v190_v46  ;;  %406 = vst.msk [vmem:[%s866_s2 + $0x18] sm:$0xf] %vm399_vm6, %v443_v55  ;;  %407 = vst.msk [vmem:[%s866_s2 + $0x1c] sm:$0xf] %vm399_vm6, %v444_v56  ;;  %v327_v40 = vsel %vm318_vm5, 1.0, %v310_v61  ;;  %v328_v41 = vsel %vm318_vm5, 1.0, %v311_v62  ;;  %v214_v1 = vpack.c.bf16 %v161_v50, %v158_v59 }
 0x164   :  { %v445_v2 = vpack.c.bf16 %v327_v40, %v327_v40  ;;  %v446_v3 = vpack.c.bf16 %v328_v41, %v328_v41  ;;  %v242_v31 = vsub.f32 %v152_v32, %v226_v63  ;;  %v243_v4 = vsub.f32 %v155_v49, %v227_v38 }
 0x165   :  { %v295_v6 = vsel %vm284_vm3, %v226_v63, %v278_v29  ;;  %v296_v7 = vsel %vm284_vm3, %v227_v38, %v279_v30  ;;  %v228_v5 = vunpack.c.l.bf16 %v214_v1  ;;  %v229_v9 = vunpack.c.h.bf16 %v214_v1 }
 0x166   :  { %408 = vst.msk [vmem:[%s866_s2 + $0x20] sm:$0xf] %vm399_vm6, %v445_v2  ;;  %409 = vst.msk [vmem:[%s866_s2 + $0x24] sm:$0xf] %vm399_vm6, %v446_v3  ;;  %v312_v8 = vsel %vm301_vm4, %v242_v31, %v295_v6  ;;  %v313_v28 = vsel %vm301_vm4, %v243_v4, %v296_v7  ;;  %v167_v60 = vpop.xlane.xlu1 %166  ;;  %v266_v20 = vsel %vm250_vm1, %v191_v51, 0.0  ;;  %v282_v36 = vsel %vm267_vm2, %v206_v0, %v265_v12 }
 0x167   :  { %v329_v45 = vsel %vm318_vm5, 1.0, %v312_v8  ;;  %v330_v14 = vsel %vm318_vm5, 1.0, %v313_v28  ;;  %v244_v15 = vsub.f32 %v158_v59, %v228_v5  ;;  %v245_v16 = vsub.f32 %v161_v50, %v229_v9 }
 0x168   :  { %v447_v17 = vpack.c.bf16 %v329_v45, %v329_v45  ;;  %v448_v13 = vpack.c.bf16 %v330_v14, %v330_v14  ;;  %v297_v18 = vsel %vm284_vm3, %v228_v5, %v280_v33  ;;  %v298_v19 = vsel %vm284_vm3, %v229_v9, %v281_v44 }
 0x169   :  { %v314_v21 = vsel %vm301_vm4, %v244_v15, %v297_v18  ;;  %v315_v22 = vsel %vm301_vm4, %v245_v16, %v298_v19  ;;  %v215_v23 = vpack.c.bf16 %v167_v60, %v164_v11  ;;  %v283_v42 = vsel %vm267_vm2, %v207_v10, %v266_v20 }
 0x16a   :  { %410 = vst.msk [vmem:[%s866_s2 + $0x28] sm:$0xf] %vm399_vm6, %v447_v17  ;;  %411 = vst.msk [vmem:[%s866_s2 + $0x2c] sm:$0xf] %vm399_vm6, %v448_v13  ;;  %v331_v24 = vsel %vm318_vm5, 1.0, %v314_v21  ;;  %v332_v29 = vsel %vm318_vm5, 1.0, %v315_v22 }
 0x16b   :  { %v449_v30 = vpack.c.bf16 %v331_v24, %v331_v24  ;;  %v450_v32 = vpack.c.bf16 %v332_v29, %v332_v29  ;;  %v230_v33 = vunpack.c.l.bf16 %v215_v23  ;;  %v231_v34 = vunpack.c.h.bf16 %v215_v23 }
 0x16d   :  { %412 = vst.msk [vmem:[%s866_s2 + $0x30] sm:$0xf] %vm399_vm6, %v449_v30  ;;  %413 = vst.msk [vmem:[%s866_s2 + $0x34] sm:$0xf] %vm399_vm6, %v450_v32  ;;  %v246_v37 = vsub.f32 %v164_v11, %v230_v33  ;;  %v247_v43 = vsub.f32 %v167_v60, %v231_v34  ;;  %v299_v44 = vsel %vm284_vm3, %v230_v33, %v282_v36 }
 0x16e   :  { %v300_v46 = vsel %vm284_vm3, %v231_v34, %v283_v42 }
 0x16f   :  { %v316_v47 = vsel %vm301_vm4, %v246_v37, %v299_v44  ;;  %v317_v48 = vsel %vm301_vm4, %v247_v43, %v300_v46 }
 0x170   :  { %v333_v49 = vsel %vm318_vm5, 1.0, %v316_v47  ;;  %v334_v51 = vsel %vm318_vm5, 1.0, %v317_v48 }
 0x171   :  { %v451_v39 = vpack.c.bf16 %v333_v49, %v333_v49  ;;  %v452_v25 = vpack.c.bf16 %v334_v51, %v334_v51 }
 0x173   :  { %414 = vst.msk [vmem:[%s866_s2 + $0x38] sm:$0xf] %vm399_vm6, %v451_v39  ;;  %415 = vst.msk [vmem:[%s866_s2 + $0x3c] sm:$0xf] %vm399_vm6, %v452_v25 }

</bundles_post_ra>
